<compile_context>
chip_gen: v7x
topology: tpu7x:2x2x1
jax: 0.10.0
libtpu: 0.0.40
codegen_flags: <defaults>
</compile_context>

<pallas_src>
import jax
import jax.numpy as jnp
from jax.experimental import pallas as pl
from jax.experimental.pallas import tpu as pltpu


def mine_kernel(xy_ref, w1x_ref, w1y_ref, b1_ref, w2_ref, b2_ref,
                w3_ref, b3_ref, w4_ref, b4_ref, o_ref):
    # xy_ref: (2, TN) f32 -- feature-major input tile
    x_row = xy_ref[0:1, :]                       # (1, TN)
    y_row = xy_ref[1:2, :]                       # (1, TN)

    # Layer 1 on the VPU (K=2 would waste the MXU systolic depth), f32:
    #   h1[f, n] = relu(w1[f, 0] * x[n] + w1[f, 1] * y[n] + b1[f])
    h = jnp.maximum(
        w1x_ref[...] * x_row + w1y_ref[...] * y_row + b1_ref[...], 0.0
    )                                            # (128, TN) f32

    # Layers 2-3: (128,128) @ (128,TN) on the MXU with bf16 inputs,
    # f32 accumulation; bias + ReLU stay f32.
    h = jnp.maximum(
        jnp.dot(w2_ref[...], h.astype(jnp.bfloat16),
                preferred_element_type=jnp.float32) + b2_ref[...], 0.0)
    h = jnp.maximum(
        jnp.dot(w3_ref[...], h.astype(jnp.bfloat16),
                preferred_element_type=jnp.float32) + b3_ref[...], 0.0)

    # Layer 4 off the MXU: VPU broadcast-multiply + XLU sublane reduce.
    #   out[n] = sum_f w4[f] * h[f, n] + b4      -> (1, TN), lane-dense store.
    o_ref[...] = (jnp.sum(w4_ref[...] * h, axis=0, keepdims=True)
                  + b4_ref[0])


def _tensorcores_per_chip():
    """2 TensorCores per chip on v7x; 1 on v5e/v6e."""
    try:
        kind = jax.devices()[0].device_kind.lower()
    except Exception:
        return 1
    return 2 if ("v7" in kind or "7x" in kind) else 1


def _choose_tn(n, num_cores):
    """Batch-tile size: multiple of 256 (full MXU output width, lane-dense),
    large (<=4096) to amortize the ~0.35 us/step overhead.  Only force a
    >=2-step split of small batches on dual-TC chips (v7x)."""
    def up256(v):
        return ((v + 255) // 256) * 256
    tn = min(4096, up256(n))
    if num_cores >= 2 and tn > 256 and -(-n // tn) < 2:
        tn = max(256, up256(-(-n // 2)))
    return tn


def _vmem_limit_bytes(tn):
    """Explicit scoped-VMEM budget (matters on v5e whose default is 16 MiB)."""
    act_f32 = 3 * 128 * tn * 4          # activation temporaries
    act_bf16 = 2 * 128 * tn * 2         # bf16 copies fed to the MXU
    io = 2 * (2 * tn * 4) + 2 * (1 * tn * 4)   # double-buffered in/out tiles
    weights = 2 * (2 * 128 * 128 * 2 + 128 * 2 * 4 + 6 * 128 * 4 + 16)
    budget = 2 * (act_f32 + act_bf16 + io + weights)   # 2x headroom
    return int(min(max(budget, 32 * 1024 * 1024), 48 * 1024 * 1024))


@jax.jit
def mine_forward(x, y, params):
    """x, y: (N,) arrays (any float/int dtype). params in PyTorch layout:
    (w1 (128,2), b1 (128,), w2 (128,128), b2 (128,), w3 (128,128), b3 (128,),
     w4 (1,128),  b4 (1,)). Returns (N, 1) float32."""
    w1, b1, w2, b2, w3, b3, w4, b4 = params
    n = x.shape[0]
    tn = _choose_tn(n, _tensorcores_per_chip())
    n_pad = ((n + tn - 1) // tn) * tn

    # Glue (outside the kernel): stack feature-major and pad the batch axis.
    xy = jnp.stack([x.astype(jnp.float32), y.astype(jnp.float32)], axis=0)  # (2, N)
    xy_p = jnp.pad(xy, ((0, 0), (0, n_pad - n)))

    # Parameter prep (done once, outside the kernel):
    #   layer-1 weight columns and biases 1-3 as (128, 1) for lane broadcast,
    #   layer-2/3 weights cast to bf16 (MXU inputs), layer-4 weight as a
    #   (128, 1) f32 column, scalar b4 in SMEM.
    w1x = w1[:, 0:1].astype(jnp.float32)
    w1y = w1[:, 1:2].astype(jnp.float32)
    b1c = b1.astype(jnp.float32).reshape(-1, 1)
    w2b = w2.astype(jnp.bfloat16)
    b2c = b2.astype(jnp.float32).reshape(-1, 1)
    w3b = w3.astype(jnp.bfloat16)
    b3c = b3.astype(jnp.float32).reshape(-1, 1)
    w4c = w4.astype(jnp.float32).reshape(-1, 1)   # (128, 1)
    b4s = b4.astype(jnp.float32).reshape(-1)      # (1,) scalar for SMEM

    grid = (n_pad // tn,)

    def full(a):  # whole-array block, constant index across all grid steps
        return pl.BlockSpec(a.shape, lambda i: (0,) * a.ndim)

    out_p = pl.pallas_call(
        mine_kernel,
        out_shape=jax.ShapeDtypeStruct((1, n_pad), jnp.float32),
        grid_spec=pltpu.PrefetchScalarGridSpec(
            num_scalar_prefetch=0,
            grid=grid,
            in_specs=[
                pl.BlockSpec((2, tn), lambda i: (0, i)),   # xy tile (lane-dense)
                full(w1x), full(w1y), full(b1c),
                full(w2b), full(b2c),
                full(w3b), full(b3c),
                full(w4c),
                pl.BlockSpec(memory_space=pltpu.MemorySpace.SMEM),  # b4 scalar
            ],
            out_specs=pl.BlockSpec((1, tn), lambda i: (0, i)),      # lane-dense
        ),
        compiler_params=pltpu.CompilerParams(
            dimension_semantics=("parallel",),
            vmem_limit_bytes=_vmem_limit_bytes(tn)),
    )(xy_p, w1x, w1y, b1c, w2b, b2c, w3b, b3c, w4c, b4s)

    return out_p[0, :n][:, None]


def init_params(key):
    """Deterministic init mimicking nn.Linear default (U[-1/sqrt(fan_in), +]).
    Stored in PyTorch layout: weight (out, in), bias (out,)."""
    sizes = [(2, 128), (128, 128), (128, 128), (128, 1)]
    params = []
    for i, (fan_in, fan_out) in enumerate(sizes):
        kw, kb = jax.random.split(jax.random.fold_in(key, i))
        bound = 1.0 / (fan_in ** 0.5)
        w = jax.random.uniform(kw, (fan_out, fan_in), jnp.float32, -bound, bound)
        b = jax.random.uniform(kb, (fan_out,), jnp.float32, -bound, bound)
        params += [w, b]
    return tuple(params)


def mine_reference_bf16(x, y, params):
    """Pure-JAX reference matched to the kernel's numerics: bf16 MXU inputs
    with f32 accumulation for the 128x128 layers, f32 elsewhere."""
    w1, b1, w2, b2, w3, b3, w4, b4 = params
    h = jnp.stack([x.astype(jnp.float32), y.astype(jnp.float32)], axis=1)  # (N, 2)
    h = jnp.maximum(h @ w1.T + b1, 0.0)
    h = jnp.maximum(
        jnp.dot(h.astype(jnp.bfloat16), w2.astype(jnp.bfloat16).T,
                preferred_element_type=jnp.float32) + b2, 0.0)
    h = jnp.maximum(
        jnp.dot(h.astype(jnp.bfloat16), w3.astype(jnp.bfloat16).T,
                preferred_element_type=jnp.float32) + b3, 0.0)
    return h @ w4.T + b4


def mine_reference_f32(x, y, params):
    """Full-f32 pure-JAX reference (matches the PyTorch module exactly)."""
    w1, b1, w2, b2, w3, b3, w4, b4 = params
    h = jnp.stack([x.astype(jnp.float32), y.astype(jnp.float32)], axis=1)
    h = jnp.maximum(h @ w1.T + b1, 0.0)
    h = jnp.maximum(h @ w2.T + b2, 0.0)
    h = jnp.maximum(h @ w3.T + b3, 0.0)
    return h @ w4.T + b4


if __name__ == "__main__":
    key = jax.random.PRNGKey(0)
    kx, ky, kp = jax.random.split(key, 3)

    N = 200  # batch of (x, y) sample pairs
    x = jax.random.normal(kx, (N,), jnp.float32)
    y = jax.random.normal(ky, (N,), jnp.float32)
    params = init_params(kp)

    out = mine_forward(x, y, params)
    jax.block_until_ready(out)

    assert out.shape == (N, 1), out.shape
    # Tight check against a numerics-matched (bf16-MXU) reference ...
    ref_b = mine_reference_bf16(x, y, params)
    assert jnp.allclose(out, ref_b, atol=1e-2, rtol=1e-2), \
        "mismatch vs bf16-matched reference"
    # ... and a loose sanity check against the exact f32 PyTorch semantics.
    ref_f = mine_reference_f32(x, y, params)
    assert jnp.allclose(out, ref_f, atol=5e-2, rtol=5e-2), \
        "mismatch vs f32 reference"

    print("KERNEL_OK")
</pallas_src>

<mosaic_0001>
module attributes {stable_mosaic.version = 11 : i64} {
  func.func @mine_kernel(%arg0: i32, %arg1: memref<2x256xf32, #tpu.memory_space<vmem>>, %arg2: memref<128x1xf32, #tpu.memory_space<vmem>>, %arg3: memref<128x1xf32, #tpu.memory_space<vmem>>, %arg4: memref<128x1xf32, #tpu.memory_space<vmem>>, %arg5: memref<128x128xbf16, #tpu.memory_space<vmem>>, %arg6: memref<128x1xf32, #tpu.memory_space<vmem>>, %arg7: memref<128x128xbf16, #tpu.memory_space<vmem>>, %arg8: memref<128x1xf32, #tpu.memory_space<vmem>>, %arg9: memref<128x1xf32, #tpu.memory_space<vmem>>, %arg10: memref<1xf32, #tpu.memory_space<smem>>, %arg11: memref<1x256xf32, #tpu.memory_space<vmem>>) attributes {dimension_semantics = [#tpu.dimension_semantics<parallel>], iteration_bounds = array<i64: 1>, scalar_prefetch = 0 : i64, scratch_operands = 0 : i64, tpu.core_type = #tpu.core_type<tc>, window_params = [{transform_indices = @transform_0, window_bounds = array<i64: 2, 256>}, {pipeline_mode = #tpu.pipeline_mode<synchronous>, transform_indices = @transform_1, window_bounds = array<i64: 128, 1>}, {pipeline_mode = #tpu.pipeline_mode<synchronous>, transform_indices = @transform_2, window_bounds = array<i64: 128, 1>}, {pipeline_mode = #tpu.pipeline_mode<synchronous>, transform_indices = @transform_3, window_bounds = array<i64: 128, 1>}, {pipeline_mode = #tpu.pipeline_mode<synchronous>, transform_indices = @transform_4, window_bounds = array<i64: 128, 128>}, {pipeline_mode = #tpu.pipeline_mode<synchronous>, transform_indices = @transform_5, window_bounds = array<i64: 128, 1>}, {pipeline_mode = #tpu.pipeline_mode<synchronous>, transform_indices = @transform_6, window_bounds = array<i64: 128, 128>}, {pipeline_mode = #tpu.pipeline_mode<synchronous>, transform_indices = @transform_7, window_bounds = array<i64: 128, 1>}, {pipeline_mode = #tpu.pipeline_mode<synchronous>, transform_indices = @transform_8, window_bounds = array<i64: 128, 1>}, {transform_indices = @transform_9, window_bounds = array<i64: 1>}, {transform_indices = @transform_10, window_bounds = array<i64: 1, 256>}]} {
    %c0 = arith.constant 0 : index
    %c0_0 = arith.constant 0 : index
    %0 = vector.load %arg1[%c0, %c0_0] : memref<2x256xf32, #tpu.memory_space<vmem>>, vector<1x256xf32>
    %c1 = arith.constant 1 : index
    %c0_1 = arith.constant 0 : index
    %1 = vector.load %arg1[%c1, %c0_1] : memref<2x256xf32, #tpu.memory_space<vmem>>, vector<1x256xf32>
    %c0_2 = arith.constant 0 : index
    %c0_3 = arith.constant 0 : index
    %2 = vector.load %arg2[%c0_2, %c0_3] : memref<128x1xf32, #tpu.memory_space<vmem>>, vector<128x1xf32>
    %3 = vector.broadcast %2 : vector<128x1xf32> to vector<128x256xf32>
    %4 = vector.broadcast %0 : vector<1x256xf32> to vector<128x256xf32>
    %5 = arith.mulf %3, %4 : vector<128x256xf32>
    %c0_4 = arith.constant 0 : index
    %c0_5 = arith.constant 0 : index
    %6 = vector.load %arg3[%c0_4, %c0_5] : memref<128x1xf32, #tpu.memory_space<vmem>>, vector<128x1xf32>
    %7 = vector.broadcast %6 : vector<128x1xf32> to vector<128x256xf32>
    %8 = vector.broadcast %1 : vector<1x256xf32> to vector<128x256xf32>
    %9 = arith.mulf %7, %8 : vector<128x256xf32>
    %10 = arith.addf %5, %9 : vector<128x256xf32>
    %c0_6 = arith.constant 0 : index
    %c0_7 = arith.constant 0 : index
    %11 = vector.load %arg4[%c0_6, %c0_7] : memref<128x1xf32, #tpu.memory_space<vmem>>, vector<128x1xf32>
    %12 = vector.broadcast %11 : vector<128x1xf32> to vector<128x256xf32>
    %13 = arith.addf %10, %12 : vector<128x256xf32>
    %cst = arith.constant 0.000000e+00 : f32
    %14 = vector.broadcast %cst : f32 to vector<128x256xf32>
    %15 = arith.maximumf %13, %14 : vector<128x256xf32>
    %c0_8 = arith.constant 0 : index
    %c0_9 = arith.constant 0 : index
    %16 = vector.load %arg5[%c0_8, %c0_9] : memref<128x128xbf16, #tpu.memory_space<vmem>>, vector<128x128xbf16>
    %17 = arith.truncf %15 : vector<128x256xf32> to vector<128x256xbf16>
    %cst_10 = arith.constant dense<0.000000e+00> : vector<128x256xf32>
    %18 = tpu.matmul %16, %17, %cst_10 {dimension_numbers = #tpu.dot_dimension_numbers<[1], [0], [0], [1], [0, 0, 1, 1], [], []>} : vector<128x128xbf16>, vector<128x256xbf16>, vector<128x256xf32> -> vector<128x256xf32>
    %c0_11 = arith.constant 0 : index
    %c0_12 = arith.constant 0 : index
    %19 = vector.load %arg6[%c0_11, %c0_12] : memref<128x1xf32, #tpu.memory_space<vmem>>, vector<128x1xf32>
    %20 = vector.broadcast %19 : vector<128x1xf32> to vector<128x256xf32>
    %21 = arith.addf %18, %20 : vector<128x256xf32>
    %cst_13 = arith.constant 0.000000e+00 : f32
    %22 = vector.broadcast %cst_13 : f32 to vector<128x256xf32>
    %23 = arith.maximumf %21, %22 : vector<128x256xf32>
    %c0_14 = arith.constant 0 : index
    %c0_15 = arith.constant 0 : index
    %24 = vector.load %arg7[%c0_14, %c0_15] : memref<128x128xbf16, #tpu.memory_space<vmem>>, vector<128x128xbf16>
    %25 = arith.truncf %23 : vector<128x256xf32> to vector<128x256xbf16>
    %cst_16 = arith.constant dense<0.000000e+00> : vector<128x256xf32>
    %26 = tpu.matmul %24, %25, %cst_16 {dimension_numbers = #tpu.dot_dimension_numbers<[1], [0], [0], [1], [0, 0, 1, 1], [], []>} : vector<128x128xbf16>, vector<128x256xbf16>, vector<128x256xf32> -> vector<128x256xf32>
    %c0_17 = arith.constant 0 : index
    %c0_18 = arith.constant 0 : index
    %27 = vector.load %arg8[%c0_17, %c0_18] : memref<128x1xf32, #tpu.memory_space<vmem>>, vector<128x1xf32>
    %28 = vector.broadcast %27 : vector<128x1xf32> to vector<128x256xf32>
    %29 = arith.addf %26, %28 : vector<128x256xf32>
    %cst_19 = arith.constant 0.000000e+00 : f32
    %30 = vector.broadcast %cst_19 : f32 to vector<128x256xf32>
    %31 = arith.maximumf %29, %30 : vector<128x256xf32>
    %c0_20 = arith.constant 0 : index
    %c0_21 = arith.constant 0 : index
    %32 = vector.load %arg9[%c0_20, %c0_21] : memref<128x1xf32, #tpu.memory_space<vmem>>, vector<128x1xf32>
    %33 = vector.broadcast %32 : vector<128x1xf32> to vector<128x256xf32>
    %34 = arith.mulf %33, %31 : vector<128x256xf32>
    %cst_22 = arith.constant dense<0.000000e+00> : vector<256xf32>
    %35 = vector.multi_reduction <add>, %34, %cst_22 [0] : vector<128x256xf32> to vector<256xf32>
    %36 = vector.shape_cast %35 : vector<256xf32> to vector<1x256xf32>
    %c0_23 = arith.constant 0 : index
    %37 = memref.load %arg10[%c0_23] : memref<1xf32, #tpu.memory_space<smem>>
    %38 = vector.broadcast %37 : f32 to vector<1x256xf32>
    %39 = arith.addf %36, %38 : vector<1x256xf32>
    %c0_24 = arith.constant 0 : index
    %c0_25 = arith.constant 0 : index
    %40 = vector.load %arg11[%c0_24, %c0_25] : memref<1x256xf32, #tpu.memory_space<vmem>>, vector<1x256xf32>
    tpu.vector_store %arg11[%c0_24, %c0_25], %39 {strides = array<i32>} : memref<1x256xf32, #tpu.memory_space<vmem>>, vector<1x256xf32>,
    return
  }
  func.func @transform_0(%arg0: i32) -> (i32, i32) {
    %c0_i32 = arith.constant 0 : i32
    %c0_i32_0 = arith.constant 0 : i32
    return %c0_i32, %arg0 : i32, i32
  }
  func.func @transform_1(%arg0: i32) -> (i32, i32) {
    %c0_i32 = arith.constant 0 : i32
    %c0_i32_0 = arith.constant 0 : i32
    %c0_i32_1 = arith.constant 0 : i32
    return %c0_i32, %c0_i32_0 : i32, i32
  }
  func.func @transform_2(%arg0: i32) -> (i32, i32) {
    %c0_i32 = arith.constant 0 : i32
    %c0_i32_0 = arith.constant 0 : i32
    %c0_i32_1 = arith.constant 0 : i32
    return %c0_i32, %c0_i32_0 : i32, i32
  }
  func.func @transform_3(%arg0: i32) -> (i32, i32) {
    %c0_i32 = arith.constant 0 : i32
    %c0_i32_0 = arith.constant 0 : i32
    %c0_i32_1 = arith.constant 0 : i32
    return %c0_i32, %c0_i32_0 : i32, i32
  }
  func.func @transform_4(%arg0: i32) -> (i32, i32) {
    %c0_i32 = arith.constant 0 : i32
    %c0_i32_0 = arith.constant 0 : i32
    %c0_i32_1 = arith.constant 0 : i32
    return %c0_i32, %c0_i32_0 : i32, i32
  }
  func.func @transform_5(%arg0: i32) -> (i32, i32) {
    %c0_i32 = arith.constant 0 : i32
    %c0_i32_0 = arith.constant 0 : i32
    %c0_i32_1 = arith.constant 0 : i32
    return %c0_i32, %c0_i32_0 : i32, i32
  }
  func.func @transform_6(%arg0: i32) -> (i32, i32) {
    %c0_i32 = arith.constant 0 : i32
    %c0_i32_0 = arith.constant 0 : i32
    %c0_i32_1 = arith.constant 0 : i32
    return %c0_i32, %c0_i32_0 : i32, i32
  }
  func.func @transform_7(%arg0: i32) -> (i32, i32) {
    %c0_i32 = arith.constant 0 : i32
    %c0_i32_0 = arith.constant 0 : i32
    %c0_i32_1 = arith.constant 0 : i32
    return %c0_i32, %c0_i32_0 : i32, i32
  }
  func.func @transform_8(%arg0: i32) -> (i32, i32) {
    %c0_i32 = arith.constant 0 : i32
    %c0_i32_0 = arith.constant 0 : i32
    %c0_i32_1 = arith.constant 0 : i32
    return %c0_i32, %c0_i32_0 : i32, i32
  }
  func.func @transform_9(%arg0: i32) -> i32 {
    %c0_i32 = arith.constant 0 : i32
    %c0_i32_0 = arith.constant 0 : i32
    return %c0_i32 : i32
  }
  func.func @transform_10(%arg0: i32) -> (i32, i32) {
    %c0_i32 = arith.constant 0 : i32
    %c0_i32_0 = arith.constant 0 : i32
    return %c0_i32, %arg0 : i32, i32
  }
}

</mosaic_0001>

<bundles_post_ra>
// kernel: mine_forward.1
= control target key start
LH: loop header
LB: loop body
LE: loop exit
PB: predicated region body
PF: predicated region fallthrough
CT: control target
= control target key end

     0   :  { %v1390_v0 = vmov 0   ;;  %s1900_s2 = inlined_call_operand.vmem [shape: f32[128,1], index: 2, kind: input, shape index: {}]   ;;  %s1901_s1 = inlined_call_operand.vmem [shape: f32[128,1], index: 1, kind: input, shape index: {}]   ;;  %s1902_s3 = inlined_call_operand.vmem [shape: f32[128,1], index: 3, kind: input, shape index: {}]   ;;  %s1903_s5 = inlined_call_operand.vmem [shape: f32[128,1], index: 5, kind: input, shape index: {}]   ;;  %s1904_s4 = inlined_call_operand.vmem [shape: bf16[128,128], index: 4, kind: input, shape index: {}]   ;;  %s1905_s7 = inlined_call_operand.vmem [shape: f32[128,1], index: 7, kind: input, shape index: {}]   ;;  %s1906_s0 = inlined_call_operand.vmem [shape: f32[2,256], index: 0, kind: input, shape index: {}]   ;;  %s1907_s8 = inlined_call_operand.vmem [shape: f32[128,1], index: 8, kind: input, shape index: {}]   ;;  %s1908_s6 = inlined_call_operand.vmem [shape: bf16[128,128], index: 6, kind: input, shape index: {}]   ;;  %s1909_s9 = inlined_call_operand.<no memory space> [shape: f32[1], index: 9, kind: input, shape index: {}]   ;;  %s1910_s10 = inlined_call_operand.vmem [shape: f32[1,256], index: 10, kind: output, shape index: {}]  }
   0x1   :  { %1373 = vset.pattern.permute.xlu1 %v1390_v0  ;;  %1372 = vset.pattern.permute.xlu0 %v1390_v0  ;;  %v179_v1 = vld [vmem:[%s1900_s2] sm:$0xff]  ;;  %v180_v3 = vld [vmem:[%s1900_s2 + $0x8] sm:$0xff]  ;;  %v43_v5 = vld [vmem:[%s1901_s1 + $0x18] sm:$0xff] }
   0x2   :  { %v40_v2 = vld [vmem:[%s1901_s1] sm:$0xff]  ;;  %197 = vperm.xlu1 %1373, %v179_v1   ;;  %v41_v4 = vld [vmem:[%s1901_s1 + $0x8] sm:$0xff]  ;;  %718 = vmatprep.mubr.bf16.mxu0 %v1390_v0  ;;  %v42_v6 = vld [vmem:[%s1901_s1 + $0x10] sm:$0xff] }
   0x3   :  { %58 = vperm.xlu0 %1372, %v40_v2   ;;  %1039 = vmatprep.mubr.bf16.mxu1 %v1390_v0  ;;  %v182_v7 = vld [vmem:[%s1900_s2 + $0x18] sm:$0xff]  ;;  %v181_v8 = vld [vmem:[%s1900_s2 + $0x10] sm:$0xff]  ;;  %v351_v9 = vld [vmem:[%s1902_s3 + $0x8] sm:$0xff]  ;;  %v137_v2 = vlaneseq }
   0x4   :  { %v350_v10 = vld [vmem:[%s1902_s3] sm:$0xff]  ;;  %v45_v11 = vld [vmem:[%s1901_s1 + $0x28] sm:$0xff]  ;;  %v353_v15 = vld [vmem:[%s1902_s3 + $0x18] sm:$0xff] }
   0x5   :  { %v44_v12 = vld [vmem:[%s1901_s1 + $0x20] sm:$0xff]  ;;  %v184_v13 = vld [vmem:[%s1900_s2 + $0x28] sm:$0xff]  ;;  %v352_v16 = vld [vmem:[%s1902_s3 + $0x10] sm:$0xff]  ;;  %vm1346_vm0 = vcmp.lt.s32.totalorder %v137_v2, 256 }
   0x6   :  { %202 = vperm.xlu1 %1373, %v180_v3   ;;  %v183_v14 = vld [vmem:[%s1900_s2 + $0x20] sm:$0xff]  ;;  %v47_v17 = vld [vmem:[%s1901_s1 + $0x38] sm:$0xff]  ;;  %v46_v18 = vld [vmem:[%s1901_s1 + $0x30] sm:$0xff]  ;;  %v1644_v3 = vshrl.u32 %v137_v2, 7 }
   0x7   :  { %63 = vperm.xlu0 %1372, %v41_v4   ;;  %v186_v19 = vld [vmem:[%s1900_s2 + $0x38] sm:$0xff]  ;;  %v185_v20 = vld [vmem:[%s1900_s2 + $0x30] sm:$0xff]  ;;  %v355_v21 = vld [vmem:[%s1902_s3 + $0x28] sm:$0xff] }
   0x8   :  { %v354_v22 = vld [vmem:[%s1902_s3 + $0x20] sm:$0xff]  ;;  %v49_v23 = vld [vmem:[%s1901_s1 + $0x48] sm:$0xff]  ;;  %v357_v27 = vld [vmem:[%s1902_s3 + $0x38] sm:$0xff] }
   0x9   :  { %v48_v24 = vld [vmem:[%s1901_s1 + $0x40] sm:$0xff]  ;;  %v188_v25 = vld [vmem:[%s1900_s2 + $0x48] sm:$0xff]  ;;  %v356_v28 = vld [vmem:[%s1902_s3 + $0x30] sm:$0xff] }
   0xa   :  { %73 = vperm.xlu1 %1373, %v43_v5   ;;  %v187_v26 = vld [vmem:[%s1900_s2 + $0x40] sm:$0xff]  ;;  %v51_v29 = vld [vmem:[%s1901_s1 + $0x58] sm:$0xff]  ;;  %v50_v30 = vld [vmem:[%s1901_s1 + $0x50] sm:$0xff] }
   0xb   :  { %68 = vperm.xlu0 %1372, %v42_v6   ;;  %v190_v31 = vld [vmem:[%s1900_s2 + $0x58] sm:$0xff]  ;;  %v189_v32 = vld [vmem:[%s1900_s2 + $0x50] sm:$0xff]  ;;  %v359_v33 = vld [vmem:[%s1902_s3 + $0x48] sm:$0xff] }
   0xc   :  { %v358_v34 = vld [vmem:[%s1902_s3 + $0x40] sm:$0xff]  ;;  %v53_v35 = vld [vmem:[%s1901_s1 + $0x68] sm:$0xff]  ;;  %v361_v39 = vld [vmem:[%s1902_s3 + $0x58] sm:$0xff] }
   0xd   :  { %v52_v36 = vld [vmem:[%s1901_s1 + $0x60] sm:$0xff]  ;;  %v192_v37 = vld [vmem:[%s1900_s2 + $0x68] sm:$0xff]  ;;  %v360_v40 = vld [vmem:[%s1902_s3 + $0x50] sm:$0xff] }
   0xe   :  { %212 = vperm.xlu1 %1373, %v182_v7   ;;  %v191_v38 = vld [vmem:[%s1900_s2 + $0x60] sm:$0xff]  ;;  %v55_v41 = vld [vmem:[%s1901_s1 + $0x78] sm:$0xff]  ;;  %v54_v42 = vld [vmem:[%s1901_s1 + $0x70] sm:$0xff] }
   0xf   :  { %207 = vperm.xlu0 %1372, %v181_v8   ;;  %v194_v43 = vld [vmem:[%s1900_s2 + $0x78] sm:$0xff]  ;;  %v193_v44 = vld [vmem:[%s1900_s2 + $0x70] sm:$0xff]  ;;  %v363_v45 = vld [vmem:[%s1902_s3 + $0x68] sm:$0xff]  ;;  %v139_v8 = vsub.s32 0, %v1644_v3 }
  0x10   :  { %v362_v46 = vld [vmem:[%s1902_s3 + $0x60] sm:$0xff]  ;;  %v365_v47 = vld [vmem:[%s1902_s3 + $0x78] sm:$0xff]  ;;  %v364_v48 = vld [vmem:[%s1902_s3 + $0x70] sm:$0xff] }
  0x11   :  { %v543_v49 = vld [vmem:[%s1903_s5 + $0x8] sm:$0xff]  ;;  %v542_v50 = vld [vmem:[%s1903_s5] sm:$0xff]  ;;  %v545_v51 = vld [vmem:[%s1903_s5 + $0x18] sm:$0xff] }
  0x12   :  { %373 = vperm.xlu1 %1373, %v351_v9   ;;  %v544_v52 = vld [vmem:[%s1903_s5 + $0x10] sm:$0xff]  ;;  %v547_v53 = vld [vmem:[%s1903_s5 + $0x28] sm:$0xff]  ;;  %v546_v54 = vld [vmem:[%s1903_s5 + $0x20] sm:$0xff]  ;;  %v143_v9 = vsub.s32 1, %v1644_v3 }
  0x13   :  { %368 = vperm.xlu0 %1372, %v350_v10   ;;  %v549_v55 = vld [vmem:[%s1903_s5 + $0x38] sm:$0xff]  ;;  %v548_v56 = vld [vmem:[%s1903_s5 + $0x30] sm:$0xff]  ;;  %v551_v57 = vld [vmem:[%s1903_s5 + $0x48] sm:$0xff] }
  0x14   :  { %v550_v58 = vld [vmem:[%s1903_s5 + $0x40] sm:$0xff]  ;;  %v553_v59 = vld [vmem:[%s1903_s5 + $0x58] sm:$0xff]  ;;  %v552_v60 = vld [vmem:[%s1903_s5 + $0x50] sm:$0xff] }
  0x15   :  { %v555_v61 = vld [vmem:[%s1903_s5 + $0x68] sm:$0xff]  ;;  %v554_v62 = vld [vmem:[%s1903_s5 + $0x60] sm:$0xff]  ;;  %v557_v63 = vld [vmem:[%s1903_s5 + $0x78] sm:$0xff] }
  0x16   :  { %83 = vperm.xlu1 %1373, %v45_v11   ;;  %v556_v1 = vld [vmem:[%s1903_s5 + $0x70] sm:$0xff]  ;;  %v864_v4 = vld [vmem:[%s1905_s7 + $0x8] sm:$0xff]  ;;  %v863_v5 = vld [vmem:[%s1905_s7] sm:$0xff] }
  0x17   :  { %78 = vperm.xlu0 %1372, %v44_v12   ;;  %v1353_v10 = vld [vmem:[%s1906_s0 + $0x1] ss:$2 sm:$0x3]  ;;  %v866_v11 = vld [vmem:[%s1905_s7 + $0x18] sm:$0xff] }
  0x18   :  { %v37_v12 = vld [vmem:[%s1906_s0] ss:$2 sm:$0x3] }
  0x1a   :  { %222 = vperm.xlu1 %1373, %v184_v13   ;;  %v865_v13 = vld [vmem:[%s1905_s7 + $0x10] sm:$0xff] }
  0x1b   :  { %217 = vperm.xlu0 %1372, %v183_v14  }
  0x1e   :  { %383 = vperm.xlu1 %1373, %v353_v15  }
  0x1f   :  { %378 = vperm.xlu0 %1372, %v352_v16   ;;  %v1666_v16 = vrot.slane %v1353_v10, %v139_v8 }
  0x22   :  { %93 = vperm.xlu1 %1373, %v47_v17   ;;  %v1668_v17 = vrot.slane %v1353_v10, %v143_v9 }
  0x23   :  { %88 = vperm.xlu0 %1372, %v46_v18   ;;  %v1670_v18 = vrot.slane %v37_v12, %v139_v8 }
  0x26   :  { %232 = vperm.xlu1 %1373, %v186_v19   ;;  %v1672_v19 = vrot.slane %v37_v12, %v143_v9 }
  0x27   :  { %227 = vperm.xlu0 %1372, %v185_v20   ;;  %v1153_v20 = vld [vmem:[%s1907_s8 + $0x8] sm:$0xff] }
  0x2a   :  { %393 = vperm.xlu1 %1373, %v355_v21   ;;  %v1152_v21 = vld [vmem:[%s1907_s8] sm:$0xff] }
  0x2b   :  { %388 = vperm.xlu0 %1372, %v354_v22  }
  0x2e   :  { %103 = vperm.xlu1 %1373, %v49_v23  }
  0x2f   :  { %98 = vperm.xlu0 %1372, %v48_v24  }
  0x32   :  { %242 = vperm.xlu1 %1373, %v188_v25  }
  0x33   :  { %237 = vperm.xlu0 %1372, %v187_v26  }
  0x36   :  { %403 = vperm.xlu1 %1373, %v357_v27  }
  0x37   :  { %398 = vperm.xlu0 %1372, %v356_v28   ;;  %v1154_v28 = vld [vmem:[%s1907_s8 + $0x10] sm:$0xff] }
  0x3a   :  { %113 = vperm.xlu1 %1373, %v51_v29  }
  0x3b   :  { %108 = vperm.xlu0 %1372, %v50_v30  }
  0x3e   :  { %252 = vperm.xlu1 %1373, %v190_v31  }
  0x3f   :  { %247 = vperm.xlu0 %1372, %v189_v32  }
  0x42   :  { %413 = vperm.xlu1 %1373, %v359_v33   ;;  %v867_v33 = vld [vmem:[%s1905_s7 + $0x20] sm:$0xff] }
  0x43   :  { %408 = vperm.xlu0 %1372, %v358_v34  }
  0x46   :  { %123 = vperm.xlu1 %1373, %v53_v35  }
  0x47   :  { %118 = vperm.xlu0 %1372, %v52_v36   ;;  %v1155_v36 = vld [vmem:[%s1907_s8 + $0x18] sm:$0xff] }
  0x4a   :  { %262 = vperm.xlu1 %1373, %v192_v37  }
  0x4b   :  { %257 = vperm.xlu0 %1372, %v191_v38  }
  0x4e   :  { %423 = vperm.xlu1 %1373, %v361_v39  }
  0x4f   :  { %418 = vperm.xlu0 %1372, %v360_v40  }
  0x52   :  { %133 = vperm.xlu1 %1373, %v55_v41   ;;  %v868_v41 = vld [vmem:[%s1905_s7 + $0x28] sm:$0xff] }
  0x53   :  { %128 = vperm.xlu0 %1372, %v54_v42  }
  0x56   :  { %272 = vperm.xlu1 %1373, %v194_v43  }
  0x57   :  { %267 = vperm.xlu0 %1372, %v193_v44  }
  0x5a   :  { %433 = vperm.xlu1 %1373, %v363_v45  }
  0x5b   :  { %428 = vperm.xlu0 %1372, %v362_v46  }
  0x5e   :  { %443 = vperm.xlu1 %1373, %v365_v47  }
  0x5f   :  { %438 = vperm.xlu0 %1372, %v364_v48   ;;  %v1156_v48 = vld [vmem:[%s1907_s8 + $0x20] sm:$0xff] }
  0x62   :  { %565 = vperm.xlu1 %1373, %v543_v49  }
  0x63   :  { %560 = vperm.xlu0 %1372, %v542_v50  }
  0x66   :  { %575 = vperm.xlu1 %1373, %v545_v51   ;;  %v869_v51 = vld [vmem:[%s1905_s7 + $0x30] sm:$0xff] }
  0x67   :  { %570 = vperm.xlu0 %1372, %v544_v52  }
  0x6a   :  { %585 = vperm.xlu1 %1373, %v547_v53  }
  0x6b   :  { %580 = vperm.xlu0 %1372, %v546_v54  }
  0x6e   :  { %595 = vperm.xlu1 %1373, %v549_v55  }
  0x6f   :  { %590 = vperm.xlu0 %1372, %v548_v56  }
  0x72   :  { %605 = vperm.xlu1 %1373, %v551_v57  }
  0x73   :  { %600 = vperm.xlu0 %1372, %v550_v58  }
  0x76   :  { %615 = vperm.xlu1 %1373, %v553_v59  }
  0x77   :  { %610 = vperm.xlu0 %1372, %v552_v60  }
  0x7a   :  { %625 = vperm.xlu1 %1373, %v555_v61  }
  0x7b   :  { %620 = vperm.xlu0 %1372, %v554_v62   ;;  %v1157_v62 = vld [vmem:[%s1907_s8 + $0x28] sm:$0xff] }
  0x7e   :  { %635 = vperm.xlu1 %1373, %v557_v63   ;;  %v870_v63 = vld [vmem:[%s1905_s7 + $0x38] sm:$0xff] }
  0x7f   :  { %630 = vperm.xlu0 %1372, %v556_v1  }
  0x81   :  { %v198_v6 = vpop.permute.xlu1 %197 }
  0x82   :  { %v59_v7 = vpop.permute.xlu0 %58  ;;  %886 = vperm.xlu1 %1373, %v864_v4   ;;  %v286_v24 = vmul.f32 %v1666_v16, %v198_v6  ;;  %v287_v25 = vmul.f32 %v1668_v17, %v198_v6 }
  0x83   :  { %881 = vperm.xlu0 %1372, %v863_v5   ;;  %v147_v26 = vmul.f32 %v1670_v18, %v59_v7  ;;  %v148_v27 = vmul.f32 %v1672_v19, %v59_v7 }
  0x85   :  { %v203_v14 = vpop.permute.xlu1 %202  ;;  %v318_v39 = vadd.f32 %v286_v24, %v147_v26  ;;  %v319_v40 = vadd.f32 %v287_v25, %v148_v27 }
  0x86   :  { %v64_v15 = vpop.permute.xlu0 %63  ;;  %896 = vperm.xlu1 %1373, %v866_v11   ;;  %v288_v29 = vmul.f32 %v1666_v16, %v203_v14  ;;  %v289_v30 = vmul.f32 %v1668_v17, %v203_v14  ;;  %v871_v14 = vld [vmem:[%s1905_s7 + $0x40] sm:$0xff] }
  0x87   :  { %891 = vperm.xlu0 %1372, %v865_v13   ;;  %v149_v31 = vmul.f32 %v1670_v18, %v64_v15  ;;  %v150_v32 = vmul.f32 %v1672_v19, %v64_v15  ;;  %v1158_v13 = vld [vmem:[%s1907_s8 + $0x30] sm:$0xff] }
  0x89   :  { %v74_v22 = vpop.permute.xlu1 %73  ;;  %v320_v37 = vadd.f32 %v288_v29, %v149_v31  ;;  %v321_v38 = vadd.f32 %v289_v30, %v150_v32  ;;  %v1159_v29 = vld [vmem:[%s1907_s8 + $0x38] sm:$0xff]  ;;  %v872_v30 = vld [vmem:[%s1905_s7 + $0x48] sm:$0xff] }
  0x8a   :  { %v69_v23 = vpop.permute.xlu0 %68  ;;  %1175 = vperm.xlu1 %1373, %v1153_v20   ;;  %v153_v5 = vmul.f32 %v1670_v18, %v74_v22  ;;  %v154_v6 = vmul.f32 %v1672_v19, %v74_v22 }
  0x8b   :  { %1170 = vperm.xlu0 %1372, %v1152_v21   ;;  %v151_v7 = vmul.f32 %v1670_v18, %v69_v23  ;;  %v152_v8 = vmul.f32 %v1672_v19, %v69_v23 }
  0x8d   :  { %v213_v34 = vpop.permute.xlu1 %212 }
  0x8e   :  { %v208_v35 = vpop.permute.xlu0 %207  ;;  %1180 = vperm.xlu1 %1373, %v1154_v28   ;;  %v292_v58 = vmul.f32 %v1666_v16, %v213_v34  ;;  %v293_v59 = vmul.f32 %v1668_v17, %v213_v34 }
  0x8f   :  { %901 = vperm.xlu0 %1372, %v867_v33   ;;  %v290_v60 = vmul.f32 %v1666_v16, %v208_v35  ;;  %v291_v61 = vmul.f32 %v1668_v17, %v208_v35 }
  0x90   :  { %v324_v9 = vadd.f32 %v292_v58, %v153_v5  ;;  %v325_v10 = vadd.f32 %v293_v59, %v154_v6 }
  0x91   :  { %v374_v42 = vpop.permute.xlu1 %373  ;;  %v322_v11 = vadd.f32 %v290_v60, %v151_v7  ;;  %v323_v12 = vadd.f32 %v291_v61, %v152_v8 }
  0x92   :  { %v369_v43 = vpop.permute.xlu0 %368  ;;  %v448_v44 = vadd.f32 %v374_v42, %v320_v37  ;;  %v449_v45 = vadd.f32 %v374_v42, %v321_v38  ;;  %1185 = vperm.xlu1 %1373, %v1155_v36  }
  0x93   :  { %v446_v46 = vadd.f32 %v369_v43, %v318_v39  ;;  %v447_v47 = vadd.f32 %v369_v43, %v319_v40  ;;  %906 = vperm.xlu0 %1372, %v868_v41   ;;  %v1160_v39 = vld [vmem:[%s1907_s8 + $0x40] sm:$0xff]  ;;  %v873_v40 = vld [vmem:[%s1905_s7 + $0x50] sm:$0xff] }
  0x94   :  { %v480_v49 = vmax.f32 %v448_v44, 0.0  ;;  %v481_v53 = vmax.f32 %v449_v45, 0.0 }
  0x95   :  { %v478_v50 = vmax.f32 %v446_v46, 0.0  ;;  %v479_v52 = vmax.f32 %v447_v47, 0.0  ;;  %v84_v54 = vpop.permute.xlu1 %83 }
  0x96   :  { %v79_v55 = vpop.permute.xlu0 %78  ;;  %1190 = vperm.xlu1 %1373, %v1156_v48   ;;  %v157_v43 = vmul.f32 %v1670_v18, %v84_v54  ;;  %v158_v44 = vmul.f32 %v1672_v19, %v84_v54 }
  0x97   :  { %911 = vperm.xlu0 %1372, %v869_v51   ;;  %v527_v56 = vpack.c.bf16 %v481_v53, %v479_v52  ;;  %v526_v57 = vpack.c.bf16 %v480_v49, %v478_v50  ;;  %v155_v45 = vmul.f32 %v1670_v18, %v79_v55  ;;  %v156_v46 = vmul.f32 %v1672_v19, %v79_v55  ;;  %v1161_v51 = vld [vmem:[%s1907_s8 + $0x48] sm:$0xff]  ;;  %v874_v52 = vld [vmem:[%s1905_s7 + $0x58] sm:$0xff] }
  0x99   :  { %686 = vmatprep.subr.bf16.mxu0 %v527_v56  ;;  %v223_v1 = vpop.permute.xlu1 %222 }
  0x9a   :  { %v218_v4 = vpop.permute.xlu0 %217  ;;  %687 = vmatpush1.bf16.msra.mxu0 %v526_v57  ;;  %1195 = vperm.xlu1 %1373, %v1157_v62   ;;  %v296_v35 = vmul.f32 %v1666_v16, %v223_v1  ;;  %v297_v36 = vmul.f32 %v1668_v17, %v223_v1  ;;  %v875_v1 = vld [vmem:[%s1905_s7 + $0x60] sm:$0xff] }
  0x9b   :  { %916 = vperm.xlu0 %1372, %v870_v63   ;;  %v294_v37 = vmul.f32 %v1666_v16, %v218_v4  ;;  %v295_v38 = vmul.f32 %v1668_v17, %v218_v4  ;;  %v1162_v63 = vld [vmem:[%s1907_s8 + $0x50] sm:$0xff] }
  0x9c   :  { %v328_v47 = vadd.f32 %v296_v35, %v157_v43  ;;  %v329_v48 = vadd.f32 %v297_v36, %v158_v44 }
  0x9d   :  { %v384_v15 = vpop.permute.xlu1 %383  ;;  %v326_v49 = vadd.f32 %v294_v37, %v155_v45  ;;  %v327_v50 = vadd.f32 %v295_v38, %v156_v46 }
  0x9e   :  { %v379_v20 = vpop.permute.xlu0 %378  ;;  %v452_v21 = vadd.f32 %v384_v15, %v324_v9  ;;  %v453_v22 = vadd.f32 %v384_v15, %v325_v10  ;;  %1200 = vperm.xlu1 %1373, %v1158_v13   ;;  %v876_v13 = vld [vmem:[%s1905_s7 + $0x68] sm:$0xff] }
  0x9f   :  { %v450_v23 = vadd.f32 %v379_v20, %v322_v11  ;;  %v451_v24 = vadd.f32 %v379_v20, %v323_v12  ;;  %921 = vperm.xlu0 %1372, %v871_v14   ;;  %v1163_v12 = vld [vmem:[%s1907_s8 + $0x58] sm:$0xff] }
  0xa0   :  { %v484_v25 = vmax.f32 %v452_v21, 0.0  ;;  %v485_v26 = vmax.f32 %v453_v22, 0.0 }
  0xa1   :  { %v482_v27 = vmax.f32 %v450_v23, 0.0  ;;  %v483_v28 = vmax.f32 %v451_v24, 0.0  ;;  %v94_v31 = vpop.permute.xlu1 %93 }
  0xa2   :  { %v89_v32 = vpop.permute.xlu0 %88  ;;  %1205 = vperm.xlu1 %1373, %v1159_v29   ;;  %v161_v20 = vmul.f32 %v1670_v18, %v94_v31  ;;  %v162_v21 = vmul.f32 %v1672_v19, %v94_v31  ;;  %v877_v29 = vld [vmem:[%s1905_s7 + $0x70] sm:$0xff] }
  0xa3   :  { %926 = vperm.xlu0 %1372, %v872_v30   ;;  %v529_v33 = vpack.c.bf16 %v485_v26, %v483_v28  ;;  %v528_v34 = vpack.c.bf16 %v484_v25, %v482_v27  ;;  %v159_v22 = vmul.f32 %v1670_v18, %v89_v32  ;;  %v160_v23 = vmul.f32 %v1672_v19, %v89_v32  ;;  %v1164_v28 = vld [vmem:[%s1907_s8 + $0x60] sm:$0xff] }
  0xa5   :  { %688 = vmatprep.subr.bf16.mxu0 %v529_v33  ;;  %v233_v41 = vpop.permute.xlu1 %232 }
  0xa6   :  { %v228_v42 = vpop.permute.xlu0 %227  ;;  %689 = vmatpush1.bf16.msra.mxu0 %v528_v34  ;;  %1210 = vperm.xlu1 %1373, %v1160_v39   ;;  %v300_v8 = vmul.f32 %v1666_v16, %v233_v41  ;;  %v301_v9 = vmul.f32 %v1668_v17, %v233_v41  ;;  %v878_v41 = vld [vmem:[%s1905_s7 + $0x78] sm:$0xff] }
  0xa7   :  { %931 = vperm.xlu0 %1372, %v873_v40   ;;  %v298_v10 = vmul.f32 %v1666_v16, %v228_v42  ;;  %v299_v11 = vmul.f32 %v1668_v17, %v228_v42  ;;  %v1165_v40 = vld [vmem:[%s1907_s8 + $0x68] sm:$0xff] }
  0xa8   :  { %v332_v24 = vadd.f32 %v300_v8, %v161_v20  ;;  %v333_v25 = vadd.f32 %v301_v9, %v162_v21 }
  0xa9   :  { %v394_v53 = vpop.permute.xlu1 %393  ;;  %v330_v26 = vadd.f32 %v298_v10, %v159_v22  ;;  %v331_v27 = vadd.f32 %v299_v11, %v160_v23 }
  0xaa   :  { %v389_v54 = vpop.permute.xlu0 %388  ;;  %v456_v56 = vadd.f32 %v394_v53, %v328_v47  ;;  %v457_v57 = vadd.f32 %v394_v53, %v329_v48  ;;  %1215 = vperm.xlu1 %1373, %v1161_v51   ;;  %v1166_v51 = vld [vmem:[%s1907_s8 + $0x70] sm:$0xff] }
  0xab   :  { %v454_v55 = vadd.f32 %v389_v54, %v326_v49  ;;  %v455_v58 = vadd.f32 %v389_v54, %v327_v50  ;;  %936 = vperm.xlu0 %1372, %v874_v52   ;;  %v1167_v50 = vld [vmem:[%s1907_s8 + $0x78] sm:$0xff] }
  0xac   :  { %v488_v59 = vmax.f32 %v456_v56, 0.0  ;;  %v489_v60 = vmax.f32 %v457_v57, 0.0 }
  0xad   :  { %v486_v61 = vmax.f32 %v454_v55, 0.0  ;;  %v487_v62 = vmax.f32 %v455_v58, 0.0  ;;  %v104_v4 = vpop.permute.xlu1 %103 }
  0xae   :  { %v99_v5 = vpop.permute.xlu0 %98  ;;  %1220 = vperm.xlu1 %1373, %v1162_v63   ;;  %v165_v54 = vmul.f32 %v1670_v18, %v104_v4  ;;  %v166_v56 = vmul.f32 %v1672_v19, %v104_v4 }
  0xaf   :  { %941 = vperm.xlu0 %1372, %v875_v1   ;;  %v531_v6 = vpack.c.bf16 %v489_v60, %v487_v62  ;;  %v530_v7 = vpack.c.bf16 %v488_v59, %v486_v61  ;;  %v163_v57 = vmul.f32 %v1670_v18, %v99_v5  ;;  %v164_v55 = vmul.f32 %v1672_v19, %v99_v5 }
  0xb1   :  { %690 = vmatprep.subr.bf16.mxu0 %v531_v6  ;;  %v243_v14 = vpop.permute.xlu1 %242 }
  0xb2   :  { %v238_v15 = vpop.permute.xlu0 %237  ;;  %691 = vmatpush1.bf16.msra.mxu0 %v530_v7  ;;  %1225 = vperm.xlu1 %1373, %v1163_v12   ;;  %v304_v46 = vmul.f32 %v1666_v16, %v243_v14  ;;  %v305_v47 = vmul.f32 %v1668_v17, %v243_v14 }
  0xb3   :  { %946 = vperm.xlu0 %1372, %v876_v13   ;;  %v302_v48 = vmul.f32 %v1666_v16, %v238_v15  ;;  %v303_v49 = vmul.f32 %v1668_v17, %v238_v15 }
  0xb4   :  { %v336_v58 = vadd.f32 %v304_v46, %v165_v54  ;;  %v337_v59 = vadd.f32 %v305_v47, %v166_v56 }
  0xb5   :  { %v404_v30 = vpop.permute.xlu1 %403  ;;  %v334_v60 = vadd.f32 %v302_v48, %v163_v57  ;;  %v335_v61 = vadd.f32 %v303_v49, %v164_v55 }
  0xb6   :  { %v399_v31 = vpop.permute.xlu0 %398  ;;  %v460_v33 = vadd.f32 %v404_v30, %v332_v24  ;;  %v461_v34 = vadd.f32 %v404_v30, %v333_v25  ;;  %1230 = vperm.xlu1 %1373, %v1164_v28  }
  0xb7   :  { %v458_v32 = vadd.f32 %v399_v31, %v330_v26  ;;  %v459_v35 = vadd.f32 %v399_v31, %v331_v27  ;;  %951 = vperm.xlu0 %1372, %v877_v29  }
  0xb8   :  { %v492_v36 = vmax.f32 %v460_v33, 0.0  ;;  %v493_v37 = vmax.f32 %v461_v34, 0.0 }
  0xb9   :  { %v490_v38 = vmax.f32 %v458_v32, 0.0  ;;  %v491_v39 = vmax.f32 %v459_v35, 0.0  ;;  %v114_v42 = vpop.permute.xlu1 %113 }
  0xba   :  { %v109_v43 = vpop.permute.xlu0 %108  ;;  %1235 = vperm.xlu1 %1373, %v1165_v40   ;;  %v169_v25 = vmul.f32 %v1670_v18, %v114_v42  ;;  %v170_v26 = vmul.f32 %v1672_v19, %v114_v42 }
  0xbb   :  { %956 = vperm.xlu0 %1372, %v878_v41   ;;  %v533_v44 = vpack.c.bf16 %v493_v37, %v491_v39  ;;  %v532_v45 = vpack.c.bf16 %v492_v36, %v490_v38  ;;  %v167_v27 = vmul.f32 %v1670_v18, %v109_v43  ;;  %v168_v28 = vmul.f32 %v1672_v19, %v109_v43 }
  0xbd   :  { %692 = vmatprep.subr.bf16.mxu0 %v533_v44  ;;  %v253_v52 = vpop.permute.xlu1 %252 }
  0xbe   :  { %v248_v53 = vpop.permute.xlu0 %247  ;;  %693 = vmatpush1.bf16.msra.mxu0 %v532_v45  ;;  %1245 = vperm.xlu1 %1373, %v1167_v50   ;;  %v308_v15 = vmul.f32 %v1666_v16, %v253_v52  ;;  %v309_v20 = vmul.f32 %v1668_v17, %v253_v52 }
  0xbf   :  { %1240 = vperm.xlu0 %1372, %v1166_v51   ;;  %v306_v21 = vmul.f32 %v1666_v16, %v248_v53  ;;  %v307_v22 = vmul.f32 %v1668_v17, %v248_v53 }
  0xc0   :  { %v340_v29 = vadd.f32 %v308_v15, %v169_v25  ;;  %v341_v30 = vadd.f32 %v309_v20, %v170_v26 }
  0xc1   :  { %v414_v62 = vpop.permute.xlu1 %413  ;;  %v338_v31 = vadd.f32 %v306_v21, %v167_v27  ;;  %v339_v33 = vadd.f32 %v307_v22, %v168_v28 }
  0xc2   :  { %v409_v63 = vpop.permute.xlu0 %408  ;;  %v464_v1 = vadd.f32 %v414_v62, %v336_v58  ;;  %v465_v6 = vadd.f32 %v414_v62, %v337_v59 }
  0xc3   :  { %v462_v7 = vadd.f32 %v409_v63, %v334_v60  ;;  %v463_v8 = vadd.f32 %v409_v63, %v335_v61 }
  0xc4   :  { %v496_v9 = vmax.f32 %v464_v1, 0.0  ;;  %v497_v10 = vmax.f32 %v465_v6, 0.0 }
  0xc5   :  { %v494_v4 = vmax.f32 %v462_v7, 0.0  ;;  %v495_v11 = vmax.f32 %v463_v8, 0.0  ;;  %v124_v12 = vpop.permute.xlu1 %123 }
  0xc6   :  { %v119_v13 = vpop.permute.xlu0 %118  ;;  %v173_v53 = vmul.f32 %v1670_v18, %v124_v12  ;;  %v174_v54 = vmul.f32 %v1672_v19, %v124_v12 }
  0xc7   :  { %v535_v5 = vpack.c.bf16 %v497_v10, %v495_v11  ;;  %v534_v14 = vpack.c.bf16 %v496_v9, %v494_v4  ;;  %v171_v56 = vmul.f32 %v1670_v18, %v119_v13  ;;  %v172_v57 = vmul.f32 %v1672_v19, %v119_v13 }
  0xc9   :  { %694 = vmatprep.subr.bf16.mxu0 %v535_v5  ;;  %v263_v23 = vpop.permute.xlu1 %262 }
  0xca   :  { %v258_v24 = vpop.permute.xlu0 %257  ;;  %695 = vmatpush1.bf16.msra.mxu0 %v534_v14  ;;  %v312_v43 = vmul.f32 %v1666_v16, %v263_v23  ;;  %v313_v48 = vmul.f32 %v1668_v17, %v263_v23 }
  0xcb   :  { %v310_v49 = vmul.f32 %v1666_v16, %v258_v24  ;;  %v311_v50 = vmul.f32 %v1668_v17, %v258_v24 }
  0xcc   :  { %v344_v61 = vadd.f32 %v312_v43, %v173_v53  ;;  %v345_v62 = vadd.f32 %v313_v48, %v174_v54 }
  0xcd   :  { %v424_v34 = vpop.permute.xlu1 %423  ;;  %v342_v63 = vadd.f32 %v310_v49, %v171_v56  ;;  %v343_v1 = vadd.f32 %v311_v50, %v172_v57 }
  0xce   :  { %v419_v32 = vpop.permute.xlu0 %418  ;;  %v468_v35 = vadd.f32 %v424_v34, %v340_v29  ;;  %v469_v36 = vadd.f32 %v424_v34, %v341_v30 }
  0xcf   :  { %v466_v37 = vadd.f32 %v419_v32, %v338_v31  ;;  %v467_v38 = vadd.f32 %v419_v32, %v339_v33 }
  0xd0   :  { %v500_v39 = vmax.f32 %v468_v35, 0.0  ;;  %v501_v40 = vmax.f32 %v469_v36, 0.0  ;;  %v1374_v36 = vld [vmem:[%s1904_s4] sm:$0xff]  }
  0xd1   :  { %v498_v41 = vmax.f32 %v466_v37, 0.0  ;;  %v499_v44 = vmax.f32 %v467_v38, 0.0  ;;  %v134_v42 = vpop.permute.xlu1 %133  ;;  %v1375_v37 = vld [vmem:[%s1904_s4 + $0x8] sm:$0xff]   ;;  %v1376_v38 = vld [vmem:[%s1904_s4 + $0x10] sm:$0xff]  }
  0xd2   :  { %v129_v45 = vpop.permute.xlu0 %128  ;;  %v177_v6 = vmul.f32 %v1670_v18, %v134_v42  ;;  %v178_v7 = vmul.f32 %v1672_v19, %v134_v42  ;;  %v1381_v42 = vld [vmem:[%s1904_s4 + $0x38] sm:$0xff]  }
  0xd3   :  { %v537_v46 = vpack.c.bf16 %v501_v40, %v499_v44  ;;  %v536_v47 = vpack.c.bf16 %v500_v39, %v498_v41  ;;  %v175_v8 = vmul.f32 %v1670_v18, %v129_v45  ;;  %v176_v9 = vmul.f32 %v1672_v19, %v129_v45  ;;  %v1377_v39 = vld [vmem:[%s1904_s4 + $0x18] sm:$0xff]   ;;  %v1378_v40 = vld [vmem:[%s1904_s4 + $0x20] sm:$0xff]   ;;  %v1379_v41 = vld [vmem:[%s1904_s4 + $0x28] sm:$0xff]  }
  0xd4   :  { %v1380_v44 = vld [vmem:[%s1904_s4 + $0x30] sm:$0xff]  }
  0xd5   :  { %696 = vmatprep.subr.bf16.mxu0 %v537_v46  ;;  %v273_v51 = vpop.permute.xlu1 %272 }
  0xd6   :  { %v268_v52 = vpop.permute.xlu0 %267  ;;  %697 = vmatpush1.bf16.msra.mxu0 %v536_v47  ;;  %v316_v55 = vmul.f32 %v1666_v16, %v273_v51  ;;  %v317_v58 = vmul.f32 %v1668_v17, %v273_v51 }
  0xd7   :  { %v314_v59 = vmul.f32 %v1666_v16, %v268_v52  ;;  %v315_v60 = vmul.f32 %v1668_v17, %v268_v52 }
  0xd8   :  { %v348_v5 = vadd.f32 %v316_v55, %v177_v6  ;;  %v349_v17 = vadd.f32 %v317_v58, %v178_v7 }
  0xd9   :  { %v434_v10 = vpop.permute.xlu1 %433  ;;  %v346_v14 = vadd.f32 %v314_v59, %v175_v8  ;;  %v347_v15 = vadd.f32 %v315_v60, %v176_v9 }
  0xda   :  { %v429_v4 = vpop.permute.xlu0 %428  ;;  %v472_v11 = vadd.f32 %v434_v10, %v344_v61  ;;  %v473_v12 = vadd.f32 %v434_v10, %v345_v62 }
  0xdb   :  { %v470_v13 = vadd.f32 %v429_v4, %v342_v63  ;;  %v471_v16 = vadd.f32 %v429_v4, %v343_v1 }
  0xdc   :  { %v504_v20 = vmax.f32 %v472_v11, 0.0  ;;  %v505_v21 = vmax.f32 %v473_v12, 0.0 }
  0xdd   :  { %v502_v22 = vmax.f32 %v470_v13, 0.0  ;;  %v503_v23 = vmax.f32 %v471_v16, 0.0  ;;  %v444_v24 = vpop.permute.xlu1 %443 }
  0xde   :  { %v439_v25 = vpop.permute.xlu0 %438  ;;  %v476_v26 = vadd.f32 %v444_v24, %v348_v5  ;;  %v477_v18 = vadd.f32 %v444_v24, %v349_v17 }
  0xdf   :  { %v474_v27 = vadd.f32 %v439_v25, %v346_v14  ;;  %v475_v19 = vadd.f32 %v439_v25, %v347_v15  ;;  %v539_v28 = vpack.c.bf16 %v505_v21, %v503_v23  ;;  %v538_v29 = vpack.c.bf16 %v504_v20, %v502_v22 }
  0xe0   :  { %v508_v30 = vmax.f32 %v476_v26, 0.0  ;;  %v509_v31 = vmax.f32 %v477_v18, 0.0 }
  0xe1   :  { %v506_v33 = vmax.f32 %v474_v27, 0.0  ;;  %v507_v34 = vmax.f32 %v475_v19, 0.0  ;;  %698 = vmatprep.subr.bf16.mxu0 %v539_v28  ;;  %v566_v48 = vpop.permute.xlu1 %565 }
  0xe2   :  { %699 = vmatpush1.bf16.msra.mxu0 %v538_v29  ;;  %v561_v45 = vpop.permute.xlu0 %560 }
  0xe3   :  { %v541_v32 = vpack.c.bf16 %v509_v31, %v507_v34  ;;  %v540_v35 = vpack.c.bf16 %v508_v30, %v506_v33 }
  0xe5   :  { %700 = vmatprep.subr.bf16.mxu0 %v541_v32  ;;  %v576_v1 = vpop.permute.xlu1 %575 }
  0xe6   :  { %701 = vmatpush1.bf16.msra.mxu0 %v540_v35  ;;  %v571_v59 = vpop.permute.xlu0 %570 }
  0xe9   :  { %719 = vmatmul.mubr.bf16.vlgmr.msra.gmra.mrb[0].mxu0 %v1374_v36  ;;  %v586_v21 = vpop.permute.xlu1 %585 }
  0xea   :  { %728 = vmatprep.mubr.bf16.mxu0 %v1390_v0  ;;  %v581_v5 = vpop.permute.xlu0 %580 }
  0xed   :  { %v596_v35 = vpop.permute.xlu1 %595 }
  0xee   :  { %v591_v30 = vpop.permute.xlu0 %590 }
  0xf1   :  { %729 = vmatmul.mubr.bf16.gmra.mrb[4].mxu0 %v1375_v37 }
  0xf2   :  { %738 = vmatprep.mubr.bf16.mxu0 %v1390_v0 }
  0xf9   :  { %739 = vmatmul.mubr.bf16.gmra.mrb[8].mxu0 %v1376_v38 }
  0xfa   :  { %748 = vmatprep.mubr.bf16.mxu0 %v1390_v0 }
 0x101   :  { %749 = vmatmul.mubr.bf16.gmra.mrb[12].mxu0 %v1377_v39 }
 0x102   :  { %758 = vmatprep.mubr.bf16.mxu0 %v1390_v0 }
 0x109   :  { %759 = vmatmul.mubr.bf16.gmra.mrb[16].mxu0 %v1378_v40 }
 0x10a   :  { %768 = vmatprep.mubr.bf16.mxu0 %v1390_v0 }
 0x111   :  { %769 = vmatmul.mubr.bf16.gmra.mrb[20].mxu0 %v1379_v41 }
 0x112   :  { %778 = vmatprep.mubr.bf16.mxu0 %v1390_v0 }
 0x119   :  { %779 = vmatmul.mubr.bf16.gmra.mrb[24].mxu0 %v1380_v44 }
 0x11a   :  { %788 = vmatprep.mubr.bf16.mxu0 %v1390_v0 }
 0x121   :  { %789 = vmatmul.mubr.bf16.gmra.mrb[28].mxu0 %v1381_v42 }
 0x1bc   :  { %v720_v46 = vpop.f32.mrb[0].mxu0 }
 0x1bd   :  { %v721_v47 = vadd.f32 %v720_v46, %v561_v45  ;;  %v722_v43 = vpop.f32.mrb[1].mxu0 }
 0x1be   :  { %v723_v49 = vadd.f32 %v722_v43, %v561_v45  ;;  %v724_v50 = vpop.f32.mrb[2].mxu0 }
 0x1bf   :  { %v725_v51 = vadd.f32 %v724_v50, %v566_v48  ;;  %v726_v52 = vpop.f32.mrb[3].mxu0  ;;  %v799_v54 = vmax.f32 %v721_v47, 0.0  ;;  %v601_v47 = vpop.permute.xlu0 %600 }
 0x1c0   :  { %v727_v53 = vadd.f32 %v726_v52, %v566_v48  ;;  %v800_v57 = vmax.f32 %v723_v49, 0.0 }
 0x1c1   :  { %v801_v56 = vmax.f32 %v725_v51, 0.0  ;;  %v606_v51 = vpop.permute.xlu1 %605 }
 0x1c2   :  { %v802_v55 = vmax.f32 %v727_v53, 0.0 }
 0x1c3   :  { %v847_v58 = vpack.c.bf16 %v801_v56, %v799_v54 }
 0x1c4   :  { %v730_v60 = vpop.f32.mrb[4].mxu0  ;;  %v848_v61 = vpack.c.bf16 %v802_v55, %v800_v57 }
 0x1c5   :  { %v731_v62 = vadd.f32 %v730_v60, %v571_v59  ;;  %v732_v63 = vpop.f32.mrb[5].mxu0 }
 0x1c6   :  { %v733_v6 = vadd.f32 %v732_v63, %v571_v59  ;;  %v734_v7 = vpop.f32.mrb[6].mxu0  ;;  %1007 = vmatprep.subr.bf16.mxu1 %v848_v61 }
 0x1c7   :  { %v735_v8 = vadd.f32 %v734_v7, %v576_v1  ;;  %v736_v9 = vpop.f32.mrb[7].mxu0  ;;  %1008 = vmatpush1.bf16.msra.mxu1 %v847_v58  ;;  %v803_v4 = vmax.f32 %v731_v62, 0.0  ;;  %v611_v62 = vpop.permute.xlu0 %610 }
 0x1c8   :  { %v737_v10 = vadd.f32 %v736_v9, %v576_v1  ;;  %v804_v12 = vmax.f32 %v733_v6, 0.0 }
 0x1c9   :  { %v805_v11 = vmax.f32 %v735_v8, 0.0  ;;  %v616_v8 = vpop.permute.xlu1 %615 }
 0x1ca   :  { %v806_v13 = vmax.f32 %v737_v10, 0.0 }
 0x1cb   :  { %v849_v16 = vpack.c.bf16 %v805_v11, %v803_v4 }
 0x1cc   :  { %v850_v17 = vpack.c.bf16 %v806_v13, %v804_v12  ;;  %v740_v14 = vpop.f32.mrb[8].mxu0 }
 0x1cd   :  { %v741_v15 = vadd.f32 %v740_v14, %v581_v5  ;;  %v742_v20 = vpop.f32.mrb[9].mxu0 }
 0x1ce   :  { %v743_v22 = vadd.f32 %v742_v20, %v581_v5  ;;  %v744_v23 = vpop.f32.mrb[10].mxu0  ;;  %1009 = vmatprep.subr.bf16.mxu1 %v850_v17 }
 0x1cf   :  { %v745_v24 = vadd.f32 %v744_v23, %v586_v21  ;;  %v746_v25 = vpop.f32.mrb[11].mxu0  ;;  %1010 = vmatpush1.bf16.msra.mxu1 %v849_v16  ;;  %v807_v18 = vmax.f32 %v741_v15, 0.0  ;;  %v621_v15 = vpop.permute.xlu0 %620 }
 0x1d0   :  { %v747_v26 = vadd.f32 %v746_v25, %v586_v21  ;;  %v808_v19 = vmax.f32 %v743_v22, 0.0 }
 0x1d1   :  { %v809_v27 = vmax.f32 %v745_v24, 0.0  ;;  %v626_v24 = vpop.permute.xlu1 %625 }
 0x1d2   :  { %v810_v28 = vmax.f32 %v747_v26, 0.0 }
 0x1d3   :  { %v851_v29 = vpack.c.bf16 %v809_v27, %v807_v18 }
 0x1d4   :  { %v852_v31 = vpack.c.bf16 %v810_v28, %v808_v19  ;;  %v750_v33 = vpop.f32.mrb[12].mxu0 }
 0x1d5   :  { %v751_v34 = vadd.f32 %v750_v33, %v591_v30  ;;  %v752_v32 = vpop.f32.mrb[13].mxu0 }
 0x1d6   :  { %v753_v36 = vadd.f32 %v752_v32, %v591_v30  ;;  %v754_v37 = vpop.f32.mrb[14].mxu0  ;;  %1011 = vmatprep.subr.bf16.mxu1 %v852_v31 }
 0x1d7   :  { %v755_v38 = vadd.f32 %v754_v37, %v596_v35  ;;  %v756_v39 = vpop.f32.mrb[15].mxu0  ;;  %1012 = vmatpush1.bf16.msra.mxu1 %v851_v29  ;;  %v811_v41 = vmax.f32 %v751_v34, 0.0  ;;  %v631_v34 = vpop.permute.xlu0 %630 }
 0x1d8   :  { %v757_v40 = vadd.f32 %v756_v39, %v596_v35  ;;  %v812_v42 = vmax.f32 %v753_v36, 0.0 }
 0x1d9   :  { %v813_v44 = vmax.f32 %v755_v38, 0.0  ;;  %v636_v38 = vpop.permute.xlu1 %635 }
 0x1da   :  { %v814_v45 = vmax.f32 %v757_v40, 0.0 }
 0x1db   :  { %v853_v46 = vpack.c.bf16 %v813_v44, %v811_v41 }
 0x1dc   :  { %v854_v43 = vpack.c.bf16 %v814_v45, %v812_v42  ;;  %v760_v48 = vpop.f32.mrb[16].mxu0 }
 0x1dd   :  { %v761_v49 = vadd.f32 %v760_v48, %v601_v47  ;;  %v762_v50 = vpop.f32.mrb[17].mxu0 }
 0x1de   :  { %v763_v52 = vadd.f32 %v762_v50, %v601_v47  ;;  %v764_v53 = vpop.f32.mrb[18].mxu0  ;;  %1013 = vmatprep.subr.bf16.mxu1 %v854_v43  ;;  %v1382_v50 = vld [vmem:[%s1908_s6] sm:$0xff]  }
 0x1df   :  { %v765_v54 = vadd.f32 %v764_v53, %v606_v51  ;;  %v766_v56 = vpop.f32.mrb[19].mxu0  ;;  %1014 = vmatpush1.bf16.msra.mxu1 %v853_v46  ;;  %v815_v55 = vmax.f32 %v761_v49, 0.0  ;;  %v1385_v53 = vld [vmem:[%s1908_s6 + $0x18] sm:$0xff]  }
 0x1e0   :  { %v767_v57 = vadd.f32 %v766_v56, %v606_v51  ;;  %v816_v59 = vmax.f32 %v763_v52, 0.0  ;;  %v1383_v51 = vld [vmem:[%s1908_s6 + $0x8] sm:$0xff]   ;;  %v1384_v52 = vld [vmem:[%s1908_s6 + $0x10] sm:$0xff]  }
 0x1e1   :  { %v817_v58 = vmax.f32 %v765_v54, 0.0  ;;  %v1386_v54 = vld [vmem:[%s1908_s6 + $0x20] sm:$0xff]   ;;  %v1387_v56 = vld [vmem:[%s1908_s6 + $0x28] sm:$0xff]  }
 0x1e2   :  { %v818_v60 = vmax.f32 %v767_v57, 0.0  ;;  %v1388_v57 = vld [vmem:[%s1908_s6 + $0x30] sm:$0xff]  }
 0x1e3   :  { %v855_v61 = vpack.c.bf16 %v817_v58, %v815_v55  ;;  %v1389_v55 = vld [vmem:[%s1908_s6 + $0x38] sm:$0xff]   ;;  %v887_v58 = vpop.permute.xlu1 %886 }
 0x1e4   :  { %v856_v63 = vpack.c.bf16 %v818_v60, %v816_v59  ;;  %v770_v1 = vpop.f32.mrb[20].mxu0  ;;  %v882_v59 = vpop.permute.xlu0 %881 }
 0x1e5   :  { %v771_v6 = vadd.f32 %v770_v1, %v611_v62  ;;  %v772_v7 = vpop.f32.mrb[21].mxu0 }
 0x1e6   :  { %v773_v9 = vadd.f32 %v772_v7, %v611_v62  ;;  %v774_v10 = vpop.f32.mrb[22].mxu0  ;;  %1015 = vmatprep.subr.bf16.mxu1 %v856_v63 }
 0x1e7   :  { %v775_v4 = vadd.f32 %v774_v10, %v616_v8  ;;  %v776_v11 = vpop.f32.mrb[23].mxu0  ;;  %1016 = vmatpush1.bf16.msra.mxu1 %v855_v61  ;;  %v819_v13 = vmax.f32 %v771_v6, 0.0  ;;  %v897_v60 = vpop.permute.xlu1 %896 }
 0x1e8   :  { %v777_v12 = vadd.f32 %v776_v11, %v616_v8  ;;  %v820_v5 = vmax.f32 %v773_v9, 0.0  ;;  %v892_v61 = vpop.permute.xlu0 %891 }
 0x1e9   :  { %v821_v16 = vmax.f32 %v775_v4, 0.0 }
 0x1ea   :  { %v822_v17 = vmax.f32 %v777_v12, 0.0 }
 0x1eb   :  { %v857_v14 = vpack.c.bf16 %v821_v16, %v819_v13  ;;  %v1176_v62 = vpop.permute.xlu1 %1175 }
 0x1ec   :  { %v858_v20 = vpack.c.bf16 %v822_v17, %v820_v5  ;;  %v780_v21 = vpop.f32.mrb[24].mxu0  ;;  %v1171_v63 = vpop.permute.xlu0 %1170 }
 0x1ed   :  { %v781_v22 = vadd.f32 %v780_v21, %v621_v15  ;;  %v782_v23 = vpop.f32.mrb[25].mxu0 }
 0x1ee   :  { %v783_v25 = vadd.f32 %v782_v23, %v621_v15  ;;  %v784_v26 = vpop.f32.mrb[26].mxu0  ;;  %1017 = vmatprep.subr.bf16.mxu1 %v858_v20 }
 0x1ef   :  { %v785_v18 = vadd.f32 %v784_v26, %v626_v24  ;;  %v786_v27 = vpop.f32.mrb[27].mxu0  ;;  %1018 = vmatpush1.bf16.msra.mxu1 %v857_v14  ;;  %v823_v28 = vmax.f32 %v781_v22, 0.0  ;;  %v1181_v1 = vpop.permute.xlu1 %1180 }
 0x1f0   :  { %v787_v19 = vadd.f32 %v786_v27, %v626_v24  ;;  %v824_v30 = vmax.f32 %v783_v25, 0.0  ;;  %v902_v6 = vpop.permute.xlu0 %901 }
 0x1f1   :  { %v825_v29 = vmax.f32 %v785_v18, 0.0 }
 0x1f2   :  { %v826_v31 = vmax.f32 %v787_v19, 0.0 }
 0x1f3   :  { %v859_v33 = vpack.c.bf16 %v825_v29, %v823_v28  ;;  %v1186_v7 = vpop.permute.xlu1 %1185 }
 0x1f4   :  { %v860_v32 = vpack.c.bf16 %v826_v31, %v824_v30  ;;  %v790_v35 = vpop.f32.mrb[28].mxu0  ;;  %v907_v8 = vpop.permute.xlu0 %906 }
 0x1f5   :  { %v791_v36 = vadd.f32 %v790_v35, %v631_v34  ;;  %v792_v37 = vpop.f32.mrb[29].mxu0 }
 0x1f6   :  { %v793_v39 = vadd.f32 %v792_v37, %v631_v34  ;;  %v794_v40 = vpop.f32.mrb[30].mxu0  ;;  %1019 = vmatprep.subr.bf16.mxu1 %v860_v32 }
 0x1f7   :  { %v795_v41 = vadd.f32 %v794_v40, %v636_v38  ;;  %v796_v44 = vpop.f32.mrb[31].mxu0  ;;  %1020 = vmatpush1.bf16.msra.mxu1 %v859_v33  ;;  %v827_v45 = vmax.f32 %v791_v36, 0.0  ;;  %v1191_v9 = vpop.permute.xlu1 %1190 }
 0x1f8   :  { %v797_v42 = vadd.f32 %v796_v44, %v636_v38  ;;  %v828_v47 = vmax.f32 %v793_v39, 0.0  ;;  %v1884_v10 = vpop.permute.xlu0 %911 }
 0x1f9   :  { %v829_v46 = vmax.f32 %v795_v41, 0.0 }
 0x1fa   :  { %v830_v43 = vmax.f32 %v797_v42, 0.0 }
 0x1fb   :  { %v861_v48 = vpack.c.bf16 %v829_v46, %v827_v45  ;;  %v1196_v20 = vpop.permute.xlu1 %1195 }
 0x1fc   :  { %v862_v49 = vpack.c.bf16 %v830_v43, %v828_v47  ;;  %v1886_v22 = vpop.permute.xlu0 %916 }
 0x1fe   :  { %1021 = vmatprep.subr.bf16.mxu1 %v862_v49 }
 0x1ff   :  { %1022 = vmatpush1.bf16.msra.mxu1 %v861_v48  ;;  %v1201_v34 = vpop.permute.xlu1 %1200 }
 0x200   :  { %v922_v37 = vpop.permute.xlu0 %921 }
 0x202   :  { %1040 = vmatmul.mubr.bf16.vlgmr.msra.gmra.mrb[0].mxu1 %v1382_v50 }
 0x203   :  { %1049 = vmatprep.mubr.bf16.mxu1 %v1390_v0  ;;  %v1206_v49 = vpop.permute.xlu1 %1205 }
 0x20a   :  { %1050 = vmatmul.mubr.bf16.gmra.mrb[4].mxu1 %v1383_v51 }
 0x20b   :  { %1059 = vmatprep.mubr.bf16.mxu1 %v1390_v0 }
 0x212   :  { %1060 = vmatmul.mubr.bf16.gmra.mrb[8].mxu1 %v1384_v52 }
 0x213   :  { %1069 = vmatprep.mubr.bf16.mxu1 %v1390_v0 }
 0x21a   :  { %1070 = vmatmul.mubr.bf16.gmra.mrb[12].mxu1 %v1385_v53  ;;  %v927_v53 = vpop.permute.xlu0 %926 }
 0x21b   :  { %1079 = vmatprep.mubr.bf16.mxu1 %v1390_v0 }
 0x222   :  { %1080 = vmatmul.mubr.bf16.gmra.mrb[16].mxu1 %v1386_v54 }
 0x223   :  { %1089 = vmatprep.mubr.bf16.mxu1 %v1390_v0 }
 0x22a   :  { %1090 = vmatmul.mubr.bf16.gmra.mrb[20].mxu1 %v1387_v56 }
 0x22b   :  { %1099 = vmatprep.mubr.bf16.mxu1 %v1390_v0 }
 0x232   :  { %1100 = vmatmul.mubr.bf16.gmra.mrb[24].mxu1 %v1388_v57 }
 0x233   :  { %1109 = vmatprep.mubr.bf16.mxu1 %v1390_v0 }
 0x23a   :  { %1110 = vmatmul.mubr.bf16.gmra.mrb[28].mxu1 %v1389_v55 }
 0x2d5   :  { %v1041_v4 = vpop.f32.mrb[0].mxu1 }
 0x2d6   :  { %v1042_v0 = vadd.f32 %v1041_v4, %v882_v59  ;;  %v1043_v11 = vpop.f32.mrb[1].mxu1 }
 0x2d7   :  { %v1044_v12 = vadd.f32 %v1043_v11, %v882_v59  ;;  %v1045_v13 = vpop.f32.mrb[2].mxu1 }
 0x2d8   :  { %v1120_v16 = vmax.f32 %v1042_v0, 0.0  ;;  %v1046_v5 = vadd.f32 %v1045_v13, %v887_v58  ;;  %v1047_v17 = vpop.f32.mrb[3].mxu1  ;;  %v1211_v0 = vpop.permute.xlu1 %1210 }
 0x2d9   :  { %v1121_v14 = vmax.f32 %v1044_v12, 0.0  ;;  %v1048_v15 = vadd.f32 %v1047_v17, %v887_v58  ;;  %v932_v12 = vpop.permute.xlu0 %931 }
 0x2da   :  { %v1122_v21 = vmax.f32 %v1046_v5, 0.0  ;;  %v1248_v24 = vmul.f32 %v1171_v63, %v1120_v16 }
 0x2db   :  { %v1123_v23 = vmax.f32 %v1048_v15, 0.0  ;;  %v1249_v26 = vmul.f32 %v1171_v63, %v1121_v14 }
 0x2dc   :  { %v1250_v25 = vmul.f32 %v1176_v62, %v1122_v21 }
 0x2dd   :  { %v1251_v18 = vmul.f32 %v1176_v62, %v1123_v23  ;;  %v1051_v27 = vpop.f32.mrb[4].mxu1 }
 0x2de   :  { %v1280_v19 = vadd.f32 %v1250_v25, %v1248_v24  ;;  %v1052_v28 = vadd.f32 %v1051_v27, %v892_v61  ;;  %v1053_v29 = vpop.f32.mrb[5].mxu1 }
 0x2df   :  { %v1301_v30 = vadd.f32 %v1251_v18, %v1249_v26  ;;  %v1054_v31 = vadd.f32 %v1053_v29, %v892_v61  ;;  %v1055_v33 = vpop.f32.mrb[6].mxu1  ;;  %v1216_v18 = vpop.permute.xlu1 %1215 }
 0x2e0   :  { %v1124_v32 = vmax.f32 %v1052_v28, 0.0  ;;  %v1056_v35 = vadd.f32 %v1055_v33, %v897_v60  ;;  %v1057_v36 = vpop.f32.mrb[7].mxu1 }
 0x2e1   :  { %v1125_v38 = vmax.f32 %v1054_v31, 0.0  ;;  %v1058_v39 = vadd.f32 %v1057_v36, %v897_v60 }
 0x2e2   :  { %v1252_v40 = vmul.f32 %v1181_v1, %v1124_v32  ;;  %v1126_v41 = vmax.f32 %v1056_v35, 0.0 }
 0x2e3   :  { %v1253_v44 = vmul.f32 %v1181_v1, %v1125_v38  ;;  %v1127_v42 = vmax.f32 %v1058_v39, 0.0 }
 0x2e4   :  { %v1281_v45 = vadd.f32 %v1280_v19, %v1252_v40  ;;  %v1254_v46 = vmul.f32 %v1186_v7, %v1126_v41 }
 0x2e5   :  { %v1302_v47 = vadd.f32 %v1301_v30, %v1253_v44  ;;  %v1255_v43 = vmul.f32 %v1186_v7, %v1127_v42  ;;  %v1061_v48 = vpop.f32.mrb[8].mxu1  ;;  %v1221_v44 = vpop.permute.xlu1 %1220 }
 0x2e6   :  { %v1282_v50 = vadd.f32 %v1281_v45, %v1254_v46  ;;  %v1062_v51 = vadd.f32 %v1061_v48, %v902_v6  ;;  %v1063_v52 = vpop.f32.mrb[9].mxu1 }
 0x2e7   :  { %v1303_v54 = vadd.f32 %v1302_v47, %v1255_v43  ;;  %v1064_v56 = vadd.f32 %v1063_v52, %v902_v6  ;;  %v1065_v57 = vpop.f32.mrb[10].mxu1 }
 0x2e8   :  { %v1128_v55 = vmax.f32 %v1062_v51, 0.0  ;;  %v1066_v58 = vadd.f32 %v1065_v57, %v907_v8  ;;  %v1067_v59 = vpop.f32.mrb[11].mxu1 }
 0x2e9   :  { %v1129_v60 = vmax.f32 %v1064_v56, 0.0  ;;  %v1068_v61 = vadd.f32 %v1067_v59, %v907_v8 }
 0x2ea   :  { %v1256_v62 = vmul.f32 %v1191_v9, %v1128_v55  ;;  %v1130_v63 = vmax.f32 %v1066_v58, 0.0  ;;  %v1226_v55 = vpop.permute.xlu1 %1225 }
 0x2eb   :  { %v1257_v1 = vmul.f32 %v1191_v9, %v1129_v60  ;;  %v1131_v4 = vmax.f32 %v1068_v61, 0.0 }
 0x2ec   :  { %v1283_v7 = vadd.f32 %v1282_v50, %v1256_v62  ;;  %v1258_v11 = vmul.f32 %v1196_v20, %v1130_v63 }
 0x2ed   :  { %v1304_v13 = vadd.f32 %v1303_v54, %v1257_v1  ;;  %v1259_v16 = vmul.f32 %v1196_v20, %v1131_v4  ;;  %v1071_v5 = vpop.f32.mrb[12].mxu1  ;;  %v937_v20 = vpop.permute.xlu0 %936 }
 0x2ee   :  { %v1284_v17 = vadd.f32 %v1283_v7, %v1258_v11  ;;  %v1072_v6 = vadd.f32 %v1071_v5, %v1884_v10  ;;  %v1073_v14 = vpop.f32.mrb[13].mxu1 }
 0x2ef   :  { %v1305_v15 = vadd.f32 %v1304_v13, %v1259_v16  ;;  %v1074_v21 = vadd.f32 %v1073_v14, %v1884_v10  ;;  %v1075_v23 = vpop.f32.mrb[14].mxu1 }
 0x2f0   :  { %v1132_v8 = vmax.f32 %v1072_v6, 0.0  ;;  %v1076_v24 = vadd.f32 %v1075_v23, %v1886_v22  ;;  %v1077_v9 = vpop.f32.mrb[15].mxu1 }
 0x2f1   :  { %v1133_v25 = vmax.f32 %v1074_v21, 0.0  ;;  %v1078_v26 = vadd.f32 %v1077_v9, %v1886_v22  ;;  %v942_v46 = vpop.permute.xlu0 %941 }
 0x2f2   :  { %v1260_v27 = vmul.f32 %v1201_v34, %v1132_v8  ;;  %v1134_v19 = vmax.f32 %v1076_v24, 0.0 }
 0x2f3   :  { %v1261_v28 = vmul.f32 %v1201_v34, %v1133_v25  ;;  %v1135_v29 = vmax.f32 %v1078_v26, 0.0 }
 0x2f4   :  { %v1285_v30 = vadd.f32 %v1284_v17, %v1260_v27  ;;  %v1262_v31 = vmul.f32 %v1206_v49, %v1134_v19  ;;  %v1231_v17 = vpop.permute.xlu1 %1230 }
 0x2f5   :  { %v1306_v33 = vadd.f32 %v1305_v15, %v1261_v28  ;;  %v1263_v32 = vmul.f32 %v1206_v49, %v1135_v29  ;;  %v1081_v35 = vpop.f32.mrb[16].mxu1  ;;  %v947_v60 = vpop.permute.xlu0 %946 }
 0x2f6   :  { %v1286_v10 = vadd.f32 %v1285_v30, %v1262_v31  ;;  %v1082_v36 = vadd.f32 %v1081_v35, %v922_v37  ;;  %v1083_v38 = vpop.f32.mrb[17].mxu1 }
 0x2f7   :  { %v1307_v39 = vadd.f32 %v1306_v33, %v1263_v32  ;;  %v1084_v40 = vadd.f32 %v1083_v38, %v922_v37  ;;  %v1085_v41 = vpop.f32.mrb[18].mxu1 }
 0x2f8   :  { %v1136_v42 = vmax.f32 %v1082_v36, 0.0  ;;  %v1086_v22 = vadd.f32 %v1085_v41, %v927_v53  ;;  %v1087_v45 = vpop.f32.mrb[19].mxu1  ;;  %v1236_v33 = vpop.permute.xlu1 %1235 }
 0x2f9   :  { %v1137_v47 = vmax.f32 %v1084_v40, 0.0  ;;  %v1088_v43 = vadd.f32 %v1087_v45, %v927_v53  ;;  %v952_v15 = vpop.permute.xlu0 %951 }
 0x2fa   :  { %v1264_v34 = vmul.f32 %v1211_v0, %v1136_v42  ;;  %v1138_v48 = vmax.f32 %v1086_v22, 0.0 }
 0x2fb   :  { %v1265_v50 = vmul.f32 %v1211_v0, %v1137_v47  ;;  %v1139_v51 = vmax.f32 %v1088_v43, 0.0 }
 0x2fc   :  { %v1287_v52 = vadd.f32 %v1286_v10, %v1264_v34  ;;  %v1266_v49 = vmul.f32 %v1216_v18, %v1138_v48 }
 0x2fd   :  { %v1308_v54 = vadd.f32 %v1307_v39, %v1265_v50  ;;  %v1267_v56 = vmul.f32 %v1216_v18, %v1139_v51  ;;  %v1091_v57 = vpop.f32.mrb[20].mxu1  ;;  %v957_v32 = vpop.permute.xlu0 %956 }
 0x2fe   :  { %v1288_v58 = vadd.f32 %v1287_v52, %v1266_v49  ;;  %v1092_v37 = vadd.f32 %v1091_v57, %v932_v12  ;;  %v1093_v59 = vpop.f32.mrb[21].mxu1 }
 0x2ff   :  { %v1309_v61 = vadd.f32 %v1308_v54, %v1267_v56  ;;  %v1094_v62 = vadd.f32 %v1093_v59, %v932_v12  ;;  %v1095_v63 = vpop.f32.mrb[22].mxu1  ;;  %v1246_v56 = vpop.permute.xlu1 %1245 }
 0x300   :  { %v1140_v1 = vmax.f32 %v1092_v37, 0.0  ;;  %v1096_v4 = vadd.f32 %v1095_v63, %v937_v20  ;;  %v1097_v53 = vpop.f32.mrb[23].mxu1 }
 0x301   :  { %v1141_v7 = vmax.f32 %v1094_v62, 0.0  ;;  %v1098_v11 = vadd.f32 %v1097_v53, %v937_v20  ;;  %v1241_v50 = vpop.permute.xlu0 %1240 }
 0x302   :  { %v1268_v0 = vmul.f32 %v1221_v44, %v1140_v1  ;;  %v1142_v13 = vmax.f32 %v1096_v4, 0.0 }
 0x303   :  { %v1269_v16 = vmul.f32 %v1221_v44, %v1141_v7  ;;  %v1143_v5 = vmax.f32 %v1098_v11, 0.0 }
 0x304   :  { %v1289_v6 = vadd.f32 %v1288_v58, %v1268_v0  ;;  %v1270_v14 = vmul.f32 %v1226_v55, %v1142_v13  ;;  %v1391_v0 = vmov 1966171168  }
 0x305   :  { %v1310_v21 = vadd.f32 %v1309_v61, %v1269_v16  ;;  %v1271_v23 = vmul.f32 %v1226_v55, %v1143_v5  ;;  %v1101_v8 = vpop.f32.mrb[24].mxu1  ;;  %v1330_v13 = vunpack.c.l.s4 %v1391_v0 }
 0x306   :  { %v1290_v24 = vadd.f32 %v1289_v6, %v1270_v14  ;;  %v1102_v9 = vadd.f32 %v1101_v8, %v942_v46  ;;  %v1103_v12 = vpop.f32.mrb[25].mxu1  ;;  %v1323_v6 = vstv %s1909_s9 }
 0x307   :  { %v1311_v25 = vadd.f32 %v1310_v21, %v1271_v23  ;;  %v1104_v26 = vadd.f32 %v1103_v12, %v942_v46  ;;  %v1105_v18 = vpop.f32.mrb[26].mxu1 }
 0x308   :  { %v1144_v27 = vmax.f32 %v1102_v9, 0.0  ;;  %v1106_v19 = vadd.f32 %v1105_v18, %v947_v60  ;;  %v1107_v20 = vpop.f32.mrb[27].mxu1 }
 0x309   :  { %v1145_v28 = vmax.f32 %v1104_v26, 0.0  ;;  %v1108_v29 = vadd.f32 %v1107_v20, %v947_v60 }
 0x30a   :  { %v1272_v30 = vmul.f32 %v1231_v17, %v1144_v27  ;;  %v1146_v31 = vmax.f32 %v1106_v19, 0.0 }
 0x30b   :  { %v1273_v35 = vmul.f32 %v1231_v17, %v1145_v28  ;;  %v1147_v10 = vmax.f32 %v1108_v29, 0.0 }
 0x30c   :  { %v1291_v36 = vadd.f32 %v1290_v24, %v1272_v30  ;;  %v1274_v38 = vmul.f32 %v1236_v33, %v1146_v31 }
 0x30d   :  { %v1312_v39 = vadd.f32 %v1311_v25, %v1273_v35  ;;  %v1275_v40 = vmul.f32 %v1236_v33, %v1147_v10  ;;  %v1111_v41 = vpop.f32.mrb[28].mxu1 }
 0x30e   :  { %v1292_v44 = vadd.f32 %v1291_v36, %v1274_v38  ;;  %v1112_v42 = vadd.f32 %v1111_v41, %v952_v15  ;;  %v1113_v22 = vpop.f32.mrb[29].mxu1 }
 0x30f   :  { %v1313_v45 = vadd.f32 %v1312_v39, %v1275_v40  ;;  %v1114_v46 = vadd.f32 %v1113_v22, %v952_v15  ;;  %v1115_v47 = vpop.f32.mrb[30].mxu1  ;;  %v1331_v15 = vunpack.c.0.s8 %v1330_v13 }
 0x310   :  { %v1148_v43 = vmax.f32 %v1112_v42, 0.0  ;;  %v1116_v34 = vadd.f32 %v1115_v47, %v957_v32  ;;  %v1117_v48 = vpop.f32.mrb[31].mxu1 }
 0x311   :  { %v1149_v51 = vmax.f32 %v1114_v46, 0.0  ;;  %v1118_v52 = vadd.f32 %v1117_v48, %v957_v32  ;;  %v1334_v9 = vsub.s32 %v1331_v15, %v1644_v3 }
 0x312   :  { %v1276_v49 = vmul.f32 %v1241_v50, %v1148_v43  ;;  %v1150_v54 = vmax.f32 %v1116_v34, 0.0 }
 0x313   :  { %v1277_v57 = vmul.f32 %v1241_v50, %v1149_v51  ;;  %v1151_v55 = vmax.f32 %v1118_v52, 0.0 }
 0x314   :  { %v1293_v58 = vadd.f32 %v1292_v44, %v1276_v49  ;;  %v1278_v37 = vmul.f32 %v1246_v56, %v1150_v54 }
 0x315   :  { %v1314_v59 = vadd.f32 %v1313_v45, %v1277_v57  ;;  %v1279_v60 = vmul.f32 %v1246_v56, %v1151_v55 }
 0x316   :  { %v1294_v61 = vadd.f32 %v1293_v58, %v1278_v37 }
 0x317   :  { %v1315_v62 = vadd.f32 %v1314_v59, %v1279_v60 }
 0x318   :  { %v1295_v63 = vrot.slane %v1294_v61, 4 }
 0x319   :  { %v1316_v1 = vrot.slane %v1315_v62, 4 }
 0x31a   :  { %v1296_v4 = vadd.f32 %v1295_v63, %v1294_v61 }
 0x31b   :  { %v1317_v53 = vadd.f32 %v1316_v1, %v1315_v62 }
 0x31c   :  { %v1297_v7 = vrot.slane %v1296_v4, 2 }
 0x31d   :  { %v1318_v11 = vrot.slane %v1317_v53, 2 }
 0x31e   :  { %v1298_v16 = vadd.f32 %v1297_v7, %v1296_v4 }
 0x31f   :  { %v1319_v5 = vadd.f32 %v1318_v11, %v1317_v53 }
 0x320   :  { %v1299_v17 = vrot.slane %v1298_v16, 1 }
 0x321   :  { %v1320_v14 = vrot.slane %v1319_v5, 1 }
 0x322   :  { %v1300_v21 = vadd.f32 %v1299_v17, %v1298_v16 }
 0x323   :  { %v1321_v23 = vadd.f32 %v1320_v14, %v1319_v5 }
 0x324   :  { %v1324_v8 = vadd.f32 %v1323_v6, %v1300_v21 }
 0x325   :  { %v1325_v24 = vadd.f32 %v1323_v6, %v1321_v23 }
 0x327   :  { %v1328_v12 = vcombine.low %v1324_v8, %v1325_v24 }
 0x329   :  { %v1335_v25 = vrot.slane %v1328_v12, %v1334_v9 }
 0x32b   :  { %v1342_v26 = vrot.slane %v1335_v25, %v1334_v9 }
 0x32d   :  { %1348 = vst.msk [vmem:[%s1910_s10] sm:$0x3] %vm1346_vm0, %v1342_v26 }

</bundles_post_ra>
